<compile_context>
chip_gen: v7x
topology: tpu7x:2x2x1
jax: 0.10.0
libtpu: 0.0.40
codegen_flags: <defaults>
</compile_context>

<pallas_src>
import functools

import jax
import jax.numpy as jnp
from jax.experimental import pallas as pl
from jax.experimental.pallas import tpu as pltpu


def _round_up(x, m):
    return -(-x // m) * m


# -----------------------------------------------------------------------------
# Pallas kernel: one batch tile, batch on the lane axis.
# -----------------------------------------------------------------------------
def fm_kernel(rhsT_ref,    # (RP, 2*Dn) f32  packed weights (tiny, grid-resident)
              xT_ref,      # (2*Dn, TB) f32  [x_num ; x_num^2]^T batch tile
              catT_ref,    # (K+2, TB)  f32  packed per-batch additive terms
              out_ref,     # (1, TB)    f32
              *, k):
    # Single MXU matmul does all the dense work for this tile.
    t = jnp.dot(rhsT_ref[...], xT_ref[...],
                preferred_element_type=jnp.float32)             # (RP, TB)

    s = t[0:k, :] + catT_ref[0:k, :]                  # (K, TB) sum of embeddings
    q = t[k:k + 1, :] + catT_ref[k:k + 1, :]          # (1, TB) sum_k sum_f emb^2
    lin = t[k + 1:k + 2, :] + catT_ref[k + 1:k + 2, :]  # (1, TB) first-order part

    fm = 0.5 * (jnp.sum(s * s, axis=0, keepdims=True) - q)       # (1, TB)
    out_ref[...] = lin + fm


# -----------------------------------------------------------------------------
# Wrapper: XLA glue (gathers + pre-reduction + weight packing) + pallas_call
# -----------------------------------------------------------------------------
def fm_forward(x_num, x_cat, params, tb=8192):
    B, Dn = x_num.shape
    K = params["w_numemb"].shape[1]
    R = K + 2                         # tight packed rows: [S_0..S_{K-1} | Q | lin]
    RP = _round_up(R, 8)              # sublane-aligned matmul rows (zero weights)

    W = params["w_numemb"]            # (Dn, K)
    bN = params["b_numemb"]           # (Dn, K)
    w_lin = params["w_lin"]           # (Dn, 1)
    bias_total = params["b_lin"][0] + params["cat_lin_b"][0]     # scalar

    # ---- categorical gathers, pre-reduced, built directly (row, batch) ------
    idx = x_cat + params["offsets"][None, :]                     # (B, Nc)
    # TODO(synk): verify via HLO dump that this gather fuses with the axis-2
    # reduce; if it materializes (K, B, Nc) at large B, switch to a segment-sum.
    sum_cat_T = jnp.sum(params["cat_emb_w"].T[:, idx], axis=2)   # (K, B)
    sq_norms = jnp.sum(params["cat_emb_w"] ** 2, axis=1)         # (n_cat_total,)
    cat_sq_sum = jnp.sum(sq_norms[idx], axis=1)                  # (B,)
    cat_lin_sum = jnp.sum(params["cat_lin_w"][idx, 0], axis=1)   # (B,)

    # ---- packed RHS weights (2Dn, RP) -> (RP, 2Dn) for the kernel ------------
    rhs = jnp.zeros((2 * Dn, RP), jnp.float32)
    rhs = rhs.at[:Dn, 0:K].set(W)                                # S section
    rhs = rhs.at[:Dn, K].set(2.0 * jnp.sum(W * bN, axis=1))      # Q: 2*sum_k W*b
    rhs = rhs.at[Dn:, K].set(jnp.sum(W * W, axis=1))             # Q: sum_k W*W
    rhs = rhs.at[:Dn, K + 1].set(w_lin[:, 0])                    # linear
    rhsT = rhs.T                                                 # (RP, 2Dn), tiny

    # ---- per-batch additive terms, tight (R, B), batch already on lanes ------
    catT_rows = jnp.concatenate([
        sum_cat_T + jnp.sum(bN, axis=0)[:, None],                # (K, B)
        (cat_sq_sum + jnp.sum(bN * bN))[None, :],                # (1, B)
        (cat_lin_sum + bias_total)[None, :],                     # (1, B)
    ], axis=0).astype(jnp.float32)                               # (R, B)

    xT_rows = jnp.concatenate([x_num.T, (x_num * x_num).T],
                              axis=0).astype(jnp.float32)        # (2Dn, B)

    # ---- batch tiling: batch on lanes, large tile, >=2 tiles when possible ---
    tb = max(128, (int(tb) // 128) * 128)
    b128 = _round_up(B, 128)
    tb = min(tb, b128)
    if b128 // tb < 2 and b128 >= 256:       # feed both v7x TensorCores
        tb = (b128 // 2 // 128) * 128
    b_pad = _round_up(B, tb)
    pad = b_pad - B

    xT = jnp.pad(xT_rows, ((0, 0), (0, pad)))                    # (2Dn, b_pad)
    catT = jnp.pad(catT_rows, ((0, 0), (0, pad)))                # (R, b_pad)
    grid = (b_pad // tb,)

    out = pl.pallas_call(
        functools.partial(fm_kernel, k=K),
        out_shape=jax.ShapeDtypeStruct((1, b_pad), jnp.float32),
        grid_spec=pltpu.PrefetchScalarGridSpec(
            num_scalar_prefetch=0,
            grid=grid,
            in_specs=[
                pl.BlockSpec((RP, 2 * Dn), lambda i: (0, 0)),    # packed weights
                pl.BlockSpec((2 * Dn, tb), lambda i: (0, i)),    # xT batch tile
                pl.BlockSpec((R, tb), lambda i: (0, i)),         # catT batch tile
            ],
            out_specs=pl.BlockSpec((1, tb), lambda i: (0, i)),   # lane-dense out
        ),
        compiler_params=pltpu.CompilerParams(
            dimension_semantics=("parallel",)),
    )(rhsT, xT, catT)

    return out[0, :B]                                            # (B,)


# -----------------------------------------------------------------------------
# Deterministic parameter construction (mirrors FM.__init__ shapes)
# -----------------------------------------------------------------------------
def make_params(key, d_num, categories, d_embed):
    n_cat_total = sum(categories)
    keys = jax.random.split(key, 6)
    params = {
        # nn.Linear(d_numerical, 1): weight (1, Dn) -> stored transposed (Dn, 1)
        "w_lin":     jax.random.normal(keys[0], (d_num, 1), jnp.float32) * 0.1,
        "b_lin":     jnp.zeros((1,), jnp.float32) + 0.05,
        # CatLinear: nn.Embedding(sum(categories), 1) + bias(1,)
        "cat_lin_w": jax.random.normal(keys[1], (n_cat_total, 1), jnp.float32) * 0.1,
        "cat_lin_b": jnp.zeros((1,), jnp.float32),
        # NumEmbedding(d_num, 1, d_embed, bias=True): weight (Dn,1,K)->(Dn,K), bias (Dn,K)
        "w_numemb":  jax.random.normal(keys[2], (d_num, d_embed), jnp.float32) * 0.2,
        "b_numemb":  jax.random.normal(keys[3], (d_num, d_embed), jnp.float32) * 0.05,
        # CatEmbedding: nn.Embedding(sum(categories), d_embed)
        "cat_emb_w": jax.random.normal(keys[4], (n_cat_total, d_embed), jnp.float32) * 0.2,
        # offsets = cumsum([0] + categories[:-1])
        "offsets":   jnp.cumsum(jnp.array([0] + list(categories[:-1]), jnp.int32)),
    }
    return params


# -----------------------------------------------------------------------------
# Pure-JAX reference (mirrors the PyTorch forward exactly)
# -----------------------------------------------------------------------------
def fm_reference(x_num, x_cat, params):
    lin = x_num @ params["w_lin"] + params["b_lin"]                      # (B,1)
    idx = x_cat + params["offsets"][None, :]
    lin = lin + jnp.sum(params["cat_lin_w"][idx], axis=1) + params["cat_lin_b"]
    num_emb = (x_num[:, :, None] * params["w_numemb"][None]
               + params["b_numemb"][None])                               # (B,Dn,K)
    cat_emb = params["cat_emb_w"][idx]                                   # (B,Nc,K)
    x_emb = jnp.concatenate([num_emb, cat_emb], axis=1)
    sq_of_sum = jnp.sum(x_emb, axis=1) ** 2
    sum_of_sq = jnp.sum(x_emb ** 2, axis=1)
    fm = 0.5 * jnp.sum(sq_of_sum - sum_of_sq, axis=1, keepdims=True)
    return (lin + fm)[:, 0]


if __name__ == "__main__":
    B = 256                       # -> 2 batch tiles of 128: exercises grid + megacore
    d_numerical = 4
    categories = [5, 7, 3, 6]
    d_embed = 4

    key = jax.random.PRNGKey(0)
    k_params, k_num, k_cat = jax.random.split(key, 3)

    params = make_params(k_params, d_numerical, categories, d_embed)

    x_num = jax.random.normal(k_num, (B, d_numerical), jnp.float32)
    maxvals = jnp.array(categories, jnp.int32)[None, :]
    x_cat = (jax.random.randint(k_cat, (B, len(categories)), 0, 10_000, jnp.int32)
             % maxvals).astype(jnp.int32)

    fwd = jax.jit(fm_forward)     # default tb=8192 clamps to 2x128 tiles at B=256
    out = jax.block_until_ready(fwd(x_num, x_cat, params))
    ref = jax.block_until_ready(fm_reference(x_num, x_cat, params))

    assert out.shape == (B,), out.shape
    assert jnp.allclose(out, ref, atol=1e-4, rtol=1e-4), \
        float(jnp.max(jnp.abs(out - ref)))
    print("KERNEL_OK")
</pallas_src>

<mosaic_0001>
module attributes {stable_mosaic.version = 11 : i64} {
  func.func @fm_kernel(%arg0: i32, %arg1: memref<8x8xf32, #tpu.memory_space<vmem>>, %arg2: memref<8x128xf32, #tpu.memory_space<vmem>>, %arg3: memref<6x128xf32, #tpu.memory_space<vmem>>, %arg4: memref<1x128xf32, #tpu.memory_space<vmem>>) attributes {dimension_semantics = [#tpu.dimension_semantics<parallel>], iteration_bounds = array<i64: 2>, scalar_prefetch = 0 : i64, scratch_operands = 0 : i64, tpu.core_type = #tpu.core_type<tc>, window_params = [{pipeline_mode = #tpu.pipeline_mode<synchronous>, transform_indices = @transform_0, window_bounds = array<i64: 8, 8>}, {transform_indices = @transform_1, window_bounds = array<i64: 8, 128>}, {transform_indices = @transform_2, window_bounds = array<i64: 6, 128>}, {transform_indices = @transform_3, window_bounds = array<i64: 1, 128>}]} {
    %c0 = arith.constant 0 : index
    %c0_0 = arith.constant 0 : index
    %0 = vector.load %arg1[%c0, %c0_0] : memref<8x8xf32, #tpu.memory_space<vmem>>, vector<8x8xf32>
    %c0_1 = arith.constant 0 : index
    %c0_2 = arith.constant 0 : index
    %1 = vector.load %arg2[%c0_1, %c0_2] : memref<8x128xf32, #tpu.memory_space<vmem>>, vector<8x128xf32>
    %cst = arith.constant dense<0.000000e+00> : vector<8x128xf32>
    %2 = tpu.matmul %0, %1, %cst {dimension_numbers = #tpu.dot_dimension_numbers<[1], [0], [0], [1], [0, 0, 1, 1], [], []>} : vector<8x8xf32>, vector<8x128xf32>, vector<8x128xf32> -> vector<8x128xf32>
    %3 = vector.extract_strided_slice %2 {offsets = [0, 0], sizes = [4, 128], strides = [1, 1]} : vector<8x128xf32> to vector<4x128xf32>
    %c0_3 = arith.constant 0 : index
    %c0_4 = arith.constant 0 : index
    %4 = vector.load %arg3[%c0_3, %c0_4] : memref<6x128xf32, #tpu.memory_space<vmem>>, vector<4x128xf32>
    %5 = arith.addf %3, %4 : vector<4x128xf32>
    %6 = vector.extract_strided_slice %2 {offsets = [4, 0], sizes = [1, 128], strides = [1, 1]} : vector<8x128xf32> to vector<1x128xf32>
    %c4 = arith.constant 4 : index
    %c0_5 = arith.constant 0 : index
    %7 = vector.load %arg3[%c4, %c0_5] : memref<6x128xf32, #tpu.memory_space<vmem>>, vector<1x128xf32>
    %8 = arith.addf %6, %7 : vector<1x128xf32>
    %9 = vector.extract_strided_slice %2 {offsets = [5, 0], sizes = [1, 128], strides = [1, 1]} : vector<8x128xf32> to vector<1x128xf32>
    %c5 = arith.constant 5 : index
    %c0_6 = arith.constant 0 : index
    %10 = vector.load %arg3[%c5, %c0_6] : memref<6x128xf32, #tpu.memory_space<vmem>>, vector<1x128xf32>
    %11 = arith.addf %9, %10 : vector<1x128xf32>
    %12 = arith.mulf %5, %5 : vector<4x128xf32>
    %cst_7 = arith.constant dense<0.000000e+00> : vector<128xf32>
    %13 = vector.multi_reduction <add>, %12, %cst_7 [0] : vector<4x128xf32> to vector<128xf32>
    %14 = vector.shape_cast %13 : vector<128xf32> to vector<1x128xf32>
    %15 = arith.subf %14, %8 : vector<1x128xf32>
    %cst_8 = arith.constant 5.000000e-01 : f32
    %16 = vector.broadcast %cst_8 : f32 to vector<1x128xf32>
    %17 = arith.mulf %16, %15 : vector<1x128xf32>
    %18 = arith.addf %11, %17 : vector<1x128xf32>
    %c0_9 = arith.constant 0 : index
    %c0_10 = arith.constant 0 : index
    %19 = vector.load %arg4[%c0_9, %c0_10] : memref<1x128xf32, #tpu.memory_space<vmem>>, vector<1x128xf32>
    tpu.vector_store %arg4[%c0_9, %c0_10], %18 {strides = array<i32>} : memref<1x128xf32, #tpu.memory_space<vmem>>, vector<1x128xf32>,
    return
  }
  func.func @transform_0(%arg0: i32) -> (i32, i32) {
    %c0_i32 = arith.constant 0 : i32
    %c0_i32_0 = arith.constant 0 : i32
    %c0_i32_1 = arith.constant 0 : i32
    return %c0_i32, %c0_i32_0 : i32, i32
  }
  func.func @transform_1(%arg0: i32) -> (i32, i32) {
    %c0_i32 = arith.constant 0 : i32
    %c0_i32_0 = arith.constant 0 : i32
    return %c0_i32, %arg0 : i32, i32
  }
  func.func @transform_2(%arg0: i32) -> (i32, i32) {
    %c0_i32 = arith.constant 0 : i32
    %c0_i32_0 = arith.constant 0 : i32
    return %c0_i32, %arg0 : i32, i32
  }
  func.func @transform_3(%arg0: i32) -> (i32, i32) {
    %c0_i32 = arith.constant 0 : i32
    %c0_i32_0 = arith.constant 0 : i32
    return %c0_i32, %arg0 : i32, i32
  }
}

</mosaic_0001>

<bundles_post_ra>
// kernel: fm_forward.1
= control target key start
LH: loop header
LB: loop body
LE: loop exit
PB: predicated region body
PF: predicated region fallthrough
CT: control target
= control target key end

     0   :  { %8 = vsyncpa [#allocation3], 0  ;;  %s617_s0 = inlined_call_operand.vmem [shape: f32[8,8], index: 0, kind: input, shape index: {}]   ;;  %s618_s1 = inlined_call_operand.vmem [shape: f32[8,256], index: 1, kind: input, shape index: {}]   ;;  %s619_s2 = inlined_call_operand.vmem [shape: f32[6,256], index: 2, kind: input, shape index: {}]   ;;  %s620_s3 = inlined_call_operand.hbm [shape: f32[1,256], index: 3, kind: output, shape index: {}]  }
   0x1   :  { %10 = vsyncpa [#allocation3 + $0x1], 0  ;;  %s511_s12 = smov 0   ;;  %s513_s13 = smov 0  }
   0x2   :  { %s515_s14 = smov 0   ;;  %s517_s15 = smov 0  }
   0x3 LB: > { %s532_s16 = sadd.s32 4294967295, %s486_s15   ;;  %s366_s17 = sadd.s32 4294967294, %s486_s15   ;;  %s486_s15 = sphi %s517_s15, %s626_s15   ;;  %s482_s14 = sphi %s515_s14, %s625_s14   ;;  %s478_s13 = sphi %s513_s13, %s624_s13   ;;  %s474_s12 = sphi %s511_s12, %s623_s12  }
   0x4   : > { %s536_s18 = sadd.s32 1, %s486_s15   ;;  %s96_s19 = sadd.s32 1, %s482_s14 }
   0x5   : > { %s93_s20 = ssub.s32 %s486_s15, %s536_s18  ;;  %p106_p0 = scmp.ne.s32.totalorder %s482_s14, %s478_s13 }
   0x6   : > { %p94_p1 = scmp.eq.s32.totalorder %s93_s20, 0  ;;  %p107_p2 = scmp.eq.s32.totalorder %s532_s16, 1 }
   0x7   : > { %p112_p3 = scmp.ne.s32.totalorder %s478_s13, %s474_s12  ;;  %p113_p4 = scmp.eq.s32.totalorder %s366_s17, 1 }
   0x8   : > { %s547_s21 = scalar_select %p94_p1, %s482_s14, %s96_s19  }
   0x9   : > { %p549_p5 = por %p107_p2, %p106_p0  ;;  %p553_p6 = por %p113_p4, %p112_p3 }
   0xa   : > { %p369_p7 = scmp.ge.s32.totalorder %s486_s15, 1  ;;  %p148_p8 = scmp.lt.s32.totalorder %s486_s15, 3 }
   0xc   : > { %p149_p9 = pnand %p369_p7, %p148_p8 }
   0xd   : > { %p174_p10 = scmp.lt.s32.totalorder (!%p149_p9), %s532_s16, 1  ;;  %v488_v0 = vmov (!%p149_p9), 0.0   ;;  %vm489_vm0 = vmmov (!%p149_p9), 0   ;;  %v182_v1 = vld [vmem:[%s617_s0] sm:$0xff] (!%p149_p9)  ;;  %vm184_vm1 = vcmask (!%p149_p9), 64512   ;;  %vm271_vm2 = vcmask (!%p149_p9), 1043456  }
   0xe   : > { %152 = sbr.rel (%p149_p9) target bundleno = 278 (0x116), region = 32  ;;  %378 = vmatprep.subr.mxu0 (!%p149_p9), %v488_v0  ;;  %380 = vmatprep.mubr.msk.f32.mxu0 (!%p149_p9), %vm489_vm0, %v488_v0  ;;  %s172_s7 = sand.u32 (!%p149_p9), 1, %s478_s13  }
   0xf   : > { %s373_s8 = sshll.u32 (!%p149_p9), %s532_s16, 4  ;;  %s173_s9 = scalar_lea.vmem (!%p149_p9), [#allocation2], %s172_s7 }
  0x10   : > { %s299_s10 = sshll.u32 (!%p149_p9), %s173_s9, 4  ;;  %s575_s19 = scalar_lea.hbm (!%p149_p9), %s620_s3, %s373_s8  ;;  %s577_s10 = int_to_ptr.vmem [resolvable:$true] %s299_s10 }
  0x11   : > { %s287_s20 = scalar_lea.sflag (!%p149_p9), [#allocation3], %s172_s7 }
  0x15   : > { %s175_s24 = scalar_select %p174_p10, %s532_s16, 1 }
  0x16   : > { %s490_s16 = smov [#allocation2]  }
  0x17   : > { %s370_s25 = sshll.u32 %s175_s24, 3  ;;  %s424_s24 = scalar_lea.vmem %s577_s10, 16 }
  0x18   : > { %s177_s28 = scalar_lea.vmem %s618_s1, %s370_s25  ;;  %s181_s6 = scalar_lea.vmem %s619_s2, %s370_s25 }
  0x19   : > { %v183_v2 = vld [vmem:[%s177_s28] sm:$0xff]  ;;  %p425_p11 = scmp.ne.s32.totalorder %s577_s10, %s424_s24  ;;  %s428_s25 = sshll.u32 %s490_s16, 4  ;;  %s429_s25 = int_to_ptr.vmem [resolvable:$false] %s428_s25 }
  0x1a   : > { %379 = vmatpush3.msra.mxu0 %v183_v2  ;;  %v260_v3 = vld [vmem:[%s181_s6 + $0x4] sm:$0x1]  ;;  %v265_v4 = vld [vmem:[%s181_s6 + $0x5] sm:$0x1]  ;;  %v258_v7 = vld [vmem:[%s181_s6] sm:$0xf]  ;;  %p431_p0 = scmp.lt.s32.totalorder %s577_s10, %s429_s25 }
  0x1b   : > { %381 = vmatmul.mubr.msk.f32.vlgmr.msra.gmra.mrb[0].mxu0 %vm184_vm1, %v182_v1  ;;  %v262_v5 = vrot.slane %v260_v3, 4  ;;  %v267_v6 = vrot.slane %v265_v4, 3  ;;  %p426_p12 = pnand %p425_p11, %p549_p5  ;;  %s430_s26 = scalar_lea.vmem %s429_s25, 32 }
  0x1c   : > { %p432_p1 = scmp.lt.s32.totalorder %s430_s26, %s424_s24 }
  0x1d   : > { %p427_p13 = pneg %p426_p12 }
  0x1e   : > { %p433_p2 = por %p432_p1, %p431_p0 }
  0x20   : > { %p434_p3 = pnand %p433_p2, %p427_p13 }
  0xee   : > { %v254_v8 = vpop.f32.mrb[0].mxu0 }
  0xef   : > { %v259_v9 = vadd.f32 %v258_v7, %v254_v8  ;;  %v264_v10 = vadd.f32 %v262_v5, %v254_v8  ;;  %v269_v11 = vadd.f32 %v267_v6, %v254_v8  ;;  %v382_v12 = vpop.f32.mrb[1].mxu0 }
  0xf1   : > { %v270_v13 = vmul.f32 %v259_v9, %v259_v9 }
  0xf3   : > { %v272_v14 = vsel %vm271_vm2, %v270_v13, 0.0 }
  0xf4   : > { %v273_v15 = vrot.slane %v272_v14, 4 }
  0xf6   : > { %v274_v16 = vadd.f32 %v273_v15, %v272_v14 }
  0xf8   : > { %v275_v17 = vrot.slane %v274_v16, 2 }
  0xfa   : > { %v276_v18 = vadd.f32 %v275_v17, %v274_v16 }
  0xfc   : > { %v277_v19 = vrot.slane %v276_v18, 1 }
  0xfe   : > { %v278_v20 = vadd.f32 %v277_v19, %v276_v18 }
 0x100   : > { %v279_v21 = vsub.f32 %v278_v20, %v264_v10 }
 0x102   : > { %v280_v22 = vmul.f32 0.5, %v279_v21 }
 0x104   : > { %v282_v23 = vrot.slane %v280_v22, 7 }
 0x106   : > { %v284_v24 = vadd.f32 %v282_v23, %v269_v11 }
 0x108   : > { %285 = vst [vmem:[%s173_s9 - $0x5] sm:$0x20] %v284_v24 }
 0x109   : > { %437 = shalt.err (!%p434_p3)
}
 0x10a   : > { %s438_s27 = scalar_lea.hbm %s575_s19, 16  ;;  %s442_s30 = scalar_lea.hbm %s620_s3, 32 }
 0x10b   : > { %p439_p4 = scmp.ne.s32.totalorder %s575_s19, %s438_s27  ;;  %p443_p9 = scmp.lt.u32.totalorder %s575_s19, %s620_s3 }
 0x10c   : > { %p444_p10 = scmp.lt.u32.totalorder %s442_s30, %s438_s27  ;;  %p446_p12 = scmp.lt.u32.totalorder %s438_s27, %s575_s19 }
 0x10d   : > { %p440_p7 = pnand %p439_p4, %p549_p5 }
 0x10e   : > { %p445_p11 = por %p444_p10, %p443_p9 }
 0x10f   : > { %p441_p8 = pneg %p440_p7 }
 0x110   : > { %p447_p13 = por %p446_p12, %p445_p11 }
 0x112   : > { %p448_p0 = pnand %p447_p13, %p441_p8 }
 0x114   : > { %451 = shalt.err (!%p448_p0)
}
 0x115   : > { %383 = dma.vmem_to_hbm [thread:$0]  (%p549_p5), %s577_s10, 16, %s575_s19, %s287_s20  }
 0x116 PF: > { %p389_p1 = scmp.ge.s32.totalorder %s486_s15, 2  ;;  %s311_s6 = sand.u32 1, %s474_s12  }
 0x117   : > { %s312_s7 = scalar_lea.sflag [#allocation3], %s311_s6 }
 0x118   : > { %p386_p2 = pnand %p389_p1, %p553_p6 }
 0x11a   : > { %469 = dma.done.wait (!%p386_p2), %s312_s7, 16  }
 0x11b   : > { %471 = vsyncadd (!%p386_p2), %s312_s7, 4294967280  ;;  %p13_p3 = scmp.ge.s32.totalorder %s536_s18, 4   ;;  %s623_s12 = smov %s478_s13 }
 0x11c   : > { %s624_s13 = smov %s482_s14  ;;  %s625_s14 = smov %s547_s21 }
 0x11d   : > { %s626_s15 = smov %s536_s18  ;;  %15 = sbr.rel (!%p13_p3) target bundleno = 3 (0x3), region = 70 }
 0x124   :  { %316 = vsyncpa [#allocation3], 1 }
 0x125   :  { %318 = vsyncpa [#allocation3 + $0x1], 1 }

</bundles_post_ra>
